<compile_context>
chip_gen: v5e
topology: v5e:2x2
jax: 0.10.0
libtpu: 0.0.40
codegen_flags: <defaults>
</compile_context>

<pallas_src>
import jax
import jax.numpy as jnp
from jax import lax
from jax.experimental import pallas as pl
from jax.experimental.pallas import tpu as pltpu


# ----------------------------- kernel body ---------------------------------

def _cond_pos_emb_kernel(text_ref, pe_ref, out_ref):
    # text_ref: (TN, D) tile of input rows
    # pe_ref:   (1, D)  positional embedding (f32), same block every grid step
    # out_ref:  (TN, D)
    x = text_ref[...].astype(jnp.float32)
    sq = jnp.sum(x * x, axis=-1, keepdims=True)
    # F.normalize(x, dim=1, eps=1e-12): x / max(||x||, 1e-12)
    #   == x * rsqrt(max(||x||^2, 1e-24))      (rsqrt -> EUP slot, nearly free)
    inv = lax.rsqrt(jnp.maximum(sq, 1e-24))
    out_ref[...] = (x * inv + pe_ref[...]).astype(out_ref.dtype)


# ------------------------- parameter construction --------------------------

def make_position_embedding(dim: int) -> jnp.ndarray:
    """Deterministic parameter init matching the PyTorch __init__."""
    i = jnp.arange(dim // 2, dtype=jnp.float32)
    p = -jnp.arange(0, dim, 2, dtype=jnp.float32) / dim
    expo = jnp.power(10000.0, p)
    pe = jnp.zeros((1, dim), dtype=jnp.float32)
    pe = pe.at[0, 0::2].set(jnp.sin(i * expo))
    pe = pe.at[0, 1::2].set(jnp.cos(i * expo))
    return pe


# ----------------------------- tuning helpers -------------------------------

def _vmem_capacity_bytes() -> int:
    """Best-effort query of physical VMEM; conservative (v7x) fallback."""
    try:
        info = pltpu.get_tpu_info()
        v = getattr(info, "vmem_capacity_bytes", None)
        if v:
            return int(v)
    except Exception:
        pass
    return 64 << 20  # v7x-sized fallback; safe on every generation


def _num_tensorcores() -> int:
    """Best-effort TensorCore count per device; fall back to 1 (v5e/v6e)."""
    try:
        info = pltpu.get_tpu_info()
        for attr in ("num_cores", "tensorcore_count", "core_count",
                     "num_tensorcores"):
            v = getattr(info, attr, None)
            if v:
                return int(v)
    except Exception:
        pass
    try:
        d = jax.devices()[0]
        for attr in ("num_cores", "core_count"):
            v = getattr(d, attr, None)
            if v:
                return int(v)
    except Exception:
        pass
    return 1


def _choose_row_tile(n: int, d: int, in_bytes: int, out_bytes: int,
                     budget_bytes: int, num_cores: int, packing: int) -> int:
    """Largest row tile whose working set fits the VMEM budget, with
    core-count-aware grid-step targeting."""
    # Double-buffered input + output tiles plus f32 compute intermediates
    # (conservative 12 B/elem covers the bf16 path where x, x*x, x*inv are live).
    bytes_per_row = d * (2 * in_bytes + 2 * out_bytes + 12)
    tile = budget_bytes // max(bytes_per_row, 1)
    tile = min(tile, 8192)  # keep the per-step vector-op working set sane
    tile = max(packing, (tile // packing) * packing)

    if num_cores > 1 and n > num_cores * packing:
        # Multi-TC chip (v7x): aim for a few grid steps per core so next-tile
        # reads overlap previous-tile writebacks, but never drop the tile
        # below ~2 MiB of HBM traffic (per-step overhead amortization).
        floor_rows = (2 << 20) // max(d * (in_bytes + out_bytes), 1)
        floor_rows = max(packing, (floor_rows // packing) * packing)
        steps_target = 4 * num_cores
        per_step = -(-n // steps_target)  # ceil
        per_step = max(packing, ((per_step + packing - 1) // packing) * packing)
        tile = min(tile, max(floor_rows, per_step))
    # Single-TC chips (v5e/v6e): no forced split — one tile if it fits.
    return tile


# ------------------------------- wrapper ------------------------------------

def condition_position_embeddings(text: jnp.ndarray, pe: jnp.ndarray,
                                  row_tile: int | None = None,
                                  vmem_limit_bytes: int | None = None
                                  ) -> jnp.ndarray:
    N, D = text.shape
    assert pe.shape == (1, D)
    out_dtype = text.dtype

    in_bytes = jnp.dtype(text.dtype).itemsize
    out_bytes = jnp.dtype(out_dtype).itemsize
    # sublane packing: 8 for 32-bit, 16 for bf16, 32 for 8-bit dtypes
    packing = max(8, 32 // max(in_bytes, 1))

    vmem_cap = _vmem_capacity_bytes()
    if vmem_limit_bytes is None:
        # ~40 MiB on 64 MiB chips (v7x), ~80 MiB on 128 MiB chips (v5e/v6e)
        vmem_limit_bytes = min((vmem_cap * 5) // 8, 80 << 20)
    # Tiling budget with headroom under the scoped limit:
    # ~24 MiB on v7x, up to 48 MiB on v5e/v6e.
    tile_budget = min((vmem_cap * 3) // 8, 48 << 20)

    if row_tile is None:
        row_tile = _choose_row_tile(N, D, in_bytes, out_bytes, tile_budget,
                                    _num_tensorcores(), packing)

    if row_tile >= N:
        # Single full block — block dims equal the array dims, always legal.
        row_tile = N
        grid_rows = 1
    else:
        # Validate/round user- or auto-supplied tile to the sublane packing so
        # the (8,128) BlockSpec divisibility rule holds.
        row_tile = max(packing, (row_tile // packing) * packing)
        grid_rows = pl.cdiv(N, row_tile)  # partial last block: OOB stores masked

    pe_f32 = pe.astype(jnp.float32)  # compute dtype; no per-step cast in kernel

    cost = pl.CostEstimate(
        flops=4 * N * D,            # x*x, row-sum, x*inv, +pe
        transcendentals=N,          # one rsqrt per row
        bytes_accessed=N * D * (in_bytes + out_bytes) + D * 4,
    )

    return pl.pallas_call(
        _cond_pos_emb_kernel,
        out_shape=jax.ShapeDtypeStruct((N, D), out_dtype),
        grid_spec=pl.GridSpec(
            grid=(grid_rows,),
            in_specs=[
                pl.BlockSpec((row_tile, D), lambda i: (i, 0)),
                pl.BlockSpec((1, D), lambda i: (0, 0)),
            ],
            out_specs=pl.BlockSpec((row_tile, D), lambda i: (i, 0)),
        ),
        compiler_params=pltpu.CompilerParams(
            dimension_semantics=("parallel",),
            vmem_limit_bytes=int(vmem_limit_bytes)),
        cost_estimate=cost,
    )(text, pe_f32)


# ------------------------------ reference -----------------------------------

def _reference(text, pe):
    x = text.astype(jnp.float32)
    norm = jnp.sqrt(jnp.sum(x * x, axis=1, keepdims=True))
    xn = x / jnp.maximum(norm, 1e-12)
    return (xn + pe.astype(jnp.float32)).astype(text.dtype)


if __name__ == "__main__":
    N, D = 16, 64  # module dim (must be even); D need not be a multiple of 128
    key = jax.random.PRNGKey(0)
    text = jax.random.normal(key, (N, D), dtype=jnp.float32)
    pe = make_position_embedding(D)

    out = jax.block_until_ready(condition_position_embeddings(text, pe))
    ref = _reference(text, pe)
    assert out.shape == (N, D)
    assert jnp.allclose(out, ref, atol=1e-5, rtol=1e-5), "mismatch vs reference"

    # Ragged N, single full block (no padding copies anywhere).
    text2 = jax.random.normal(jax.random.PRNGKey(1), (13, D), dtype=jnp.float32)
    out2 = jax.block_until_ready(condition_position_embeddings(text2, pe))
    ref2 = _reference(text2, pe)
    assert out2.shape == (13, D)
    assert jnp.allclose(out2, ref2, atol=1e-5, rtol=1e-5), "mismatch (ragged) vs reference"

    # Ragged grid: force a small row_tile so the last block is partial and
    # exercises the masked-store path (37 = 2*16 + 5).
    text3 = jax.random.normal(jax.random.PRNGKey(2), (37, D), dtype=jnp.float32)
    out3 = jax.block_until_ready(
        condition_position_embeddings(text3, pe, row_tile=16))
    ref3 = _reference(text3, pe)
    assert out3.shape == (37, D)
    assert jnp.allclose(out3, ref3, atol=1e-5, rtol=1e-5), "mismatch (partial block) vs reference"

    print("KERNEL_OK")
</pallas_src>

<mosaic_0001>
module attributes {stable_mosaic.version = 11 : i64} {
  func.func @_cond_pos_emb_kernel(%arg0: i32, %arg1: memref<16x64xf32, #tpu.memory_space<vmem>>, %arg2: memref<1x64xf32, #tpu.memory_space<vmem>>, %arg3: memref<16x64xf32, #tpu.memory_space<vmem>>) attributes {dimension_semantics = [#tpu.dimension_semantics<parallel>], iteration_bounds = array<i64: 1>, scalar_prefetch = 0 : i64, scratch_operands = 0 : i64, tpu.core_type = #tpu.core_type<tc>, window_params = [{transform_indices = @transform_0, window_bounds = array<i64: 16, 64>}, {pipeline_mode = #tpu.pipeline_mode<synchronous>, transform_indices = @transform_1, window_bounds = array<i64: 1, 64>}, {transform_indices = @transform_2, window_bounds = array<i64: 16, 64>}]} {
    %c0 = arith.constant 0 : index
    %c0_0 = arith.constant 0 : index
    %0 = vector.load %arg1[%c0, %c0_0] : memref<16x64xf32, #tpu.memory_space<vmem>>, vector<16x64xf32>
    %1 = arith.mulf %0, %0 : vector<16x64xf32>
    %cst = arith.constant dense<0.000000e+00> : vector<16xf32>
    %2 = vector.multi_reduction <add>, %1, %cst [1] : vector<16x64xf32> to vector<16xf32>
    %3 = vector.shape_cast %2 : vector<16xf32> to vector<16x1xf32>
    %cst_1 = arith.constant 1.000000e-24 : f32
    %4 = vector.broadcast %cst_1 : f32 to vector<16x1xf32>
    %5 = arith.maximumf %3, %4 : vector<16x1xf32>
    %6 = math.rsqrt %5 : vector<16x1xf32>
    %7 = vector.broadcast %6 : vector<16x1xf32> to vector<16x64xf32>
    %8 = arith.mulf %0, %7 : vector<16x64xf32>
    %c0_2 = arith.constant 0 : index
    %c0_3 = arith.constant 0 : index
    %9 = vector.load %arg2[%c0_2, %c0_3] : memref<1x64xf32, #tpu.memory_space<vmem>>, vector<1x64xf32>
    %10 = vector.broadcast %9 : vector<1x64xf32> to vector<16x64xf32>
    %11 = arith.addf %8, %10 : vector<16x64xf32>
    %c0_4 = arith.constant 0 : index
    %c0_5 = arith.constant 0 : index
    %12 = vector.load %arg3[%c0_4, %c0_5] : memref<16x64xf32, #tpu.memory_space<vmem>>, vector<16x64xf32>
    tpu.vector_store %arg3[%c0_4, %c0_5], %11 {strides = array<i32>} : memref<16x64xf32, #tpu.memory_space<vmem>>, vector<16x64xf32>,
    return
  }
  func.func @transform_0(%arg0: i32) -> (i32, i32) {
    %c0_i32 = arith.constant 0 : i32
    %c0_i32_0 = arith.constant 0 : i32
    return %arg0, %c0_i32 : i32, i32
  }
  func.func @transform_1(%arg0: i32) -> (i32, i32) {
    %c0_i32 = arith.constant 0 : i32
    %c0_i32_0 = arith.constant 0 : i32
    %c0_i32_1 = arith.constant 0 : i32
    return %c0_i32, %c0_i32_0 : i32, i32
  }
  func.func @transform_2(%arg0: i32) -> (i32, i32) {
    %c0_i32 = arith.constant 0 : i32
    %c0_i32_0 = arith.constant 0 : i32
    return %arg0, %c0_i32 : i32, i32
  }
}

</mosaic_0001>

<bundles_post_ra>
// kernel: tpu_custom_call.1
= control target key start
LH: loop header
LB: loop body
LE: loop exit
PB: predicated region body
PF: predicated region fallthrough
CT: control target
= control target key end

     0   :  { %7 = vsyncpa [#allocation3], 0  ;;  %s232_s0 = inlined_call_operand.hbm [shape: f32[16,64], index: 0, kind: input, shape index: {}]   ;;  %s233_s1 = inlined_call_operand.hbm [shape: f32[1,64], index: 1, kind: input, shape index: {}]   ;;  %s234_s2 = inlined_call_operand.hbm [shape: f32[16,64], index: 2, kind: output, shape index: {}]  }
   0x1   :  { %8 = vsyncpa [#allocation6], 0 }
   0x2   :  { %9 = vsyncpa [#allocation4], 0  ;;  %s14_s11 = sshll.u32 %s232_s0, 4  ;;  %s193_s12 = smov [#allocation2]   ;;  %s15_s11 = int_to_ptr.hbm [resolvable:$true] %s14_s11 }
   0x3   :  { %s16_s13 = sshll.u32 %s193_s12, 4  ;;  %s28_s16 = sshll.u32 %s233_s1, 4  ;;  %s17_s13 = int_to_ptr.vmem [resolvable:$true] %s16_s13  ;;  %s29_s16 = int_to_ptr.hbm [resolvable:$true] %s28_s16 }
   0x4   :  { %s194_s17 = smov 128   ;;  %s195_s18 = smov 8  }
   0x5   :  { %22 = dma.hbm_to_vmem [thread:$0]  %s15_s11, 256, %s17_s13, [#allocation3], %s194_s17, %s194_s17, %s195_s18  }
   0x6   :  { %s196_s19 = smov [#allocation5]  }
   0x7   :  { %s30_s20 = sshll.u32 %s196_s19, 4  ;;  %s31_s20 = int_to_ptr.vmem [resolvable:$true] %s30_s20 }
   0x8   :  { %33 = dma.hbm_to_vmem [thread:$0]  %s29_s16, 16, %s31_s20, [#allocation6]  }
   0x9   :  { %187 = dma.done.wait [#allocation3], 256  }
   0xa   :  { %188 = vsyncadd [#allocation3], 4294967040 }
   0xb   :  { %189 = dma.done.wait [#allocation6], 16  }
   0xc   :  { %190 = vsyncadd [#allocation6], 4294967280  ;;  %v42_v0 = vld [vmem:[#allocation2] sm:$0xff]  ;;  %vm46_vm0 = vcmask 523264   ;;  %v43_v2 = vld [vmem:[#allocation2 + $0x8] sm:$0xff]  ;;  %s197_s0 = smov [#allocation7]  }
   0xd   :  { %v44_v1 = vmul.f32 %v42_v0, %v42_v0  ;;  %v45_v4 = vmul.f32 %v43_v2, %v43_v2  ;;  %v110_v18 = vld [vmem:[#allocation5] ss:$0 sm:$0xff]  ;;  %s89_s1 = sshll.u32 %s197_s0, 4  ;;  %s91_s23 = sshll.u32 %s234_s2, 4  ;;  %s90_s1 = int_to_ptr.vmem [resolvable:$true] %s89_s1  ;;  %s92_s23 = int_to_ptr.hbm [resolvable:$true] %s91_s23 }
   0xf   :  { %v47_v3 = vsel %vm46_vm0, %v44_v1, 0.0  ;;  %v50_v5 = vsel %vm46_vm0, %v45_v4, 0.0 }
  0x10   :  { %48 = vadd.xlane.f32.xlu0 %v47_v3 }
  0x18   :  { %51 = vadd.xlane.f32.xlu0 %v50_v5 }
  0x83   :  { %v49_v6 = vpop.xlane.xlu0 %48 }
  0x84   :  { %v53_v7 = vmax.f32 %v49_v6, 1e-24 }
  0x86   :  { %111 = vrsqrt.f32 %v53_v7  ;;  %vm61_vm2 = vweird.f32 %v53_v7 }
  0x8b   :  { %v52_v8 = vpop.xlane.xlu0 %51 }
  0x8c   :  { %v112_v9 = vpop.eup %111  ;;  %v54_v10 = vmax.f32 %v52_v8, 1e-24 }
  0x8d   :  { %v56_v11 = vmul.f32 %v112_v9, %v53_v7  ;;  %vm62_vm1 = vweird.f32 %v112_v9 }
  0x8e   :  { %113 = vrsqrt.f32 %v54_v10  ;;  %vm63_vm3 = vmor %vm61_vm2, %vm62_vm1  ;;  %vm71_vm5 = vweird.f32 %v54_v10 }
  0x8f   :  { %v57_v12 = vmul.f32 %v112_v9, %v56_v11 }
  0x91   :  { %v58_v13 = vmul.f32 0.5, %v57_v12 }
  0x93   :  { %v59_v14 = vsub.f32 1.5, %v58_v13 }
  0x94   :  { %v114_v15 = vpop.eup %113 }
  0x95   :  { %v60_v16 = vmul.f32 %v112_v9, %v59_v14  ;;  %v66_v17 = vmul.f32 %v114_v15, %v54_v10  ;;  %vm72_vm4 = vweird.f32 %v114_v15 }
  0x96   :  { %vm73_vm6 = vmor %vm71_vm5, %vm72_vm4 }
  0x97   :  { %v64_v19 = vsel %vm63_vm3, %v112_v9, %v60_v16  ;;  %v67_v20 = vmul.f32 %v114_v15, %v66_v17 }
  0x98   :  { %v75_v21 = vmul.f32 %v64_v19, %v42_v0 }
  0x99   :  { %v68_v22 = vmul.f32 0.5, %v67_v20 }
  0x9a   :  { %v81_v23 = vadd.f32 %v110_v18, %v75_v21 }
  0x9b   :  { %v69_v24 = vsub.f32 1.5, %v68_v22 }
  0x9c   :  { %83 = vst.msk [vmem:[#allocation7] sm:$0xff] %vm46_vm0, %v81_v23 }
  0x9d   :  { %v70_v25 = vmul.f32 %v114_v15, %v69_v24 }
  0x9f   :  { %v74_v26 = vsel %vm73_vm6, %v114_v15, %v70_v25 }
  0xa0   :  { %v76_v27 = vmul.f32 %v74_v26, %v43_v2 }
  0xa2   :  { %v82_v28 = vadd.f32 %v110_v18, %v76_v27 }
  0xa4   :  { %84 = vst.msk [vmem:[#allocation7 + $0x8] sm:$0xff] %vm46_vm0, %v82_v28 }
  0xa5   :  { %97 = dma.vmem_to_hbm [thread:$0]  %s90_s1, 256, %s92_s23, [#allocation4], %s194_s17, %s194_s17, %s195_s18  }
  0xa6   :  { %191 = dma.done.wait [#allocation4], 256  }
  0xa7   :  { %192 = vsyncadd [#allocation4], 4294967040 }
  0xa8   :  { %102 = vsyncpa [#allocation3], 1 }
  0xa9   :  { %103 = vsyncpa [#allocation6], 1 }
  0xaa   :  { %104 = vsyncpa [#allocation4], 1 }

</bundles_post_ra>
